<compile_context>
chip_gen: v7x
topology: tpu7x:2x2x1
jax: 0.10.0
libtpu: 0.0.40
codegen_flags: <defaults>
</compile_context>

<pallas_src>
import functools

import jax
import jax.numpy as jnp
import numpy as np
from jax.experimental import pallas as pl
from jax.experimental.pallas import tpu as pltpu

EPS = 1e-5

# Headroom under a 32 MiB scoped-VMEM limit: double-buffered in+out HBM tiles
# plus ~2 f32-sized compute temporaries per element are budgeted per row.
_VMEM_WORKING_BUDGET = 24 * 1024 * 1024
# Keep the parallel row axis at several grid steps (pipeline overlap on all
# generations, and 2-TensorCore sharding on v7x) instead of one giant block.
_TARGET_ROW_STEPS = 8


def _round_up(a: int, b: int) -> int:
    return (a + b - 1) // b * b


def _adain_kernel(x_ref, mean_ref, std_ref, o_ref, *, eps: float, hw: int):
    # x_ref:    (block_rows, HW)  one row == one (n, c) instance.  The last grid
    #                             block may overhang NC; those rows hold
    #                             unspecified data and their stores are masked.
    # mean_ref: (block_rows, 1)   style mean per instance (f32)
    # std_ref:  (block_rows, 1)   style std per instance  (f32)
    x = x_ref[...].astype(jnp.float32)

    # One-pass content statistics over the spatial (lane) axis, accumulated in
    # f32: sum(x) and sum(x*x).  var = (sumsq - hw*mean^2) / (hw - 1) matches
    # torch.var(dim=2) (unbiased).  Clamp tiny negative values from f32
    # cancellation before the sqrt.
    s = jnp.sum(x, axis=-1, keepdims=True)
    sq = jnp.sum(x * x, axis=-1, keepdims=True)
    c_mean = s * jnp.float32(1.0 / hw)
    var = (sq - s * c_mean) * jnp.float32(1.0 / (hw - 1))
    var = jnp.maximum(var, jnp.float32(0.0))
    c_std = jnp.sqrt(var + eps) + eps  # matches `content_std + eps` in reference

    # Fused per-row scale/shift: out = x * scale + shift (2 tile-wide passes);
    # the reciprocal only touches the (rows, 1) vector.
    inv = pl.reciprocal(c_std, approx=False)
    scale = std_ref[...] * inv
    shift = mean_ref[...] - c_mean * scale
    o_ref[...] = (x * scale + shift).astype(o_ref.dtype)


def adaptive_instance_norm_2d(x, mean, std, *, eps: float = EPS, training: bool = True):
    """x: (N, C, H, W); mean, std: (N, C). Returns (N, C, H, W)."""
    N, C, H, W = x.shape
    if not training or (H, W) == (1, 1):
        # Matches the PyTorch module: eval mode (and degenerate spatial dims)
        # return x unchanged.
        return x

    NC = N * C
    HW = H * W
    itemsize = jnp.dtype(x.dtype).itemsize

    # Per-row VMEM cost estimate: double-buffered input + output HBM tiles
    # (2 * 2 * itemsize bytes/elem) plus ~2 f32 compute temporaries (8 bytes/elem).
    per_row_bytes = HW * (4 * itemsize + 8)

    if NC <= 8:
        # Full-extent row block (allowed even when NC is not a multiple of 8).
        block_rows = NC
    else:
        rows_budget = max(8, (_VMEM_WORKING_BUDGET // per_row_bytes) // 8 * 8)
        rows_for_steps = max(8, _round_up(pl.cdiv(NC, _TARGET_ROW_STEPS), 8))
        block_rows = int(min(rows_budget, rows_for_steps, _round_up(NC, 8)))
    grid = (pl.cdiv(NC, block_rows),)

    # 32 MiB is load-bearing on v5e (16 MiB scoped default) and safe on v7x
    # (64 MiB physical).  Only grow it when even the minimal tile needs more.
    vmem_limit = max(32 * 1024 * 1024, int(block_rows * per_row_bytes * 5) // 4)
    # TODO(synk): for extremely large H*W (a single 8-row slab exceeding the
    # scoped VMEM budget — hit first on v7x's 64 MiB part), add a second
    # "arbitrary" grid axis over HW that accumulates per-row sum/sumsq into a
    # (block_rows, 1) f32 VMEM scratch and revisits the row tiles to apply the
    # fused scale/shift.

    # Pure reshapes (no pad, no slice): HBM traffic is exactly read-x + write-out.
    x2 = x.reshape(NC, HW)
    mean2 = mean.reshape(NC, 1).astype(jnp.float32)
    std2 = std.reshape(NC, 1).astype(jnp.float32)

    kernel = functools.partial(_adain_kernel, eps=eps, hw=HW)

    out2 = pl.pallas_call(
        kernel,
        out_shape=jax.ShapeDtypeStruct((NC, HW), x.dtype),
        grid_spec=pltpu.PrefetchScalarGridSpec(
            num_scalar_prefetch=0,
            grid=grid,
            in_specs=[
                pl.BlockSpec((block_rows, HW), lambda i: (i, 0)),
                pl.BlockSpec((block_rows, 1), lambda i: (i, 0)),
                pl.BlockSpec((block_rows, 1), lambda i: (i, 0)),
            ],
            out_specs=pl.BlockSpec((block_rows, HW), lambda i: (i, 0)),
        ),
        compiler_params=pltpu.CompilerParams(
            dimension_semantics=("parallel",),
            vmem_limit_bytes=vmem_limit,
        ),
        cost_estimate=pl.CostEstimate(
            flops=6 * NC * HW,
            transcendentals=NC,
            bytes_accessed=2 * NC * HW * itemsize,
        ),
    )(x2, mean2, std2)

    return out2.reshape(N, C, H, W)


def _reference(x, mean, std, eps=EPS):
    # Pure-JAX reference mirroring the PyTorch code.
    N, C, H, W = x.shape
    xf = x.reshape(N, C, -1).astype(jnp.float32)
    c_mean = jnp.mean(xf, axis=2).reshape(N, C, 1, 1)
    c_var = jnp.var(xf, axis=2, ddof=1).reshape(N, C, 1, 1)
    c_std = jnp.sqrt(c_var + eps) + eps
    normalized = (xf.reshape(N, C, H, W) - c_mean) / c_std
    out = (normalized * std.reshape(N, C, 1, 1).astype(jnp.float32)
           + mean.reshape(N, C, 1, 1).astype(jnp.float32))
    return out.astype(x.dtype)


if __name__ == "__main__":
    root = jax.random.PRNGKey(0)

    cases = [
        # (shape, dtype, rtol, atol)
        ((2, 4, 16, 16), jnp.float32, 2e-5, 2e-5),    # HW multiple of 128, NC == block
        ((2, 13, 14, 14), jnp.float32, 2e-5, 2e-5),   # HW=196 (partial lanes), NC=26 (edge-block overhang)
        ((2, 4, 12, 12), jnp.bfloat16, 2e-2, 2e-2),   # low-precision input path
    ]

    for idx, (shape, dtype, rtol, atol) in enumerate(cases):
        kx, km, ks = jax.random.split(jax.random.fold_in(root, idx), 3)
        N, C, H, W = shape
        x = jax.random.normal(kx, shape, dtype=jnp.float32).astype(dtype)
        # AdaptiveInstanceNorm2d has no learned parameters; the style mean/std
        # are runtime inputs. Construct them deterministically.
        style_mean = jax.random.normal(km, (N, C), dtype=jnp.float32)
        style_std = jax.random.uniform(ks, (N, C), dtype=jnp.float32, minval=0.5, maxval=1.5)

        out = adaptive_instance_norm_2d(x, style_mean, style_std, training=True)
        out = jax.block_until_ready(out)

        ref = _reference(x, style_mean, style_std)
        np.testing.assert_allclose(
            np.asarray(out.astype(jnp.float32)),
            np.asarray(ref.astype(jnp.float32)),
            rtol=rtol, atol=atol,
        )

    print("KERNEL_OK")
</pallas_src>

<mosaic_0001>
module attributes {stable_mosaic.version = 11 : i64} {
  func.func @_adain_kernel(%arg0: i32, %arg1: memref<8x256xf32, #tpu.memory_space<vmem>>, %arg2: memref<8x1xf32, #tpu.memory_space<vmem>>, %arg3: memref<8x1xf32, #tpu.memory_space<vmem>>, %arg4: memref<8x256xf32, #tpu.memory_space<vmem>>) attributes {dimension_semantics = [#tpu.dimension_semantics<parallel>], iteration_bounds = array<i64: 1>, scalar_prefetch = 0 : i64, scratch_operands = 0 : i64, tpu.core_type = #tpu.core_type<tc>, window_params = [{transform_indices = @transform_0, window_bounds = array<i64: 8, 256>}, {transform_indices = @transform_1, window_bounds = array<i64: 8, 1>}, {transform_indices = @transform_2, window_bounds = array<i64: 8, 1>}, {transform_indices = @transform_3, window_bounds = array<i64: 8, 256>}]} {
    %c0 = arith.constant 0 : index
    %c0_0 = arith.constant 0 : index
    %0 = vector.load %arg1[%c0, %c0_0] : memref<8x256xf32, #tpu.memory_space<vmem>>, vector<8x256xf32>
    %cst = arith.constant dense<0.000000e+00> : vector<8xf32>
    %1 = vector.multi_reduction <add>, %0, %cst [1] : vector<8x256xf32> to vector<8xf32>
    %2 = vector.shape_cast %1 : vector<8xf32> to vector<8x1xf32>
    %3 = arith.mulf %0, %0 : vector<8x256xf32>
    %cst_1 = arith.constant dense<0.000000e+00> : vector<8xf32>
    %4 = vector.multi_reduction <add>, %3, %cst_1 [1] : vector<8x256xf32> to vector<8xf32>
    %5 = vector.shape_cast %4 : vector<8xf32> to vector<8x1xf32>
    %cst_2 = arith.constant 3.906250e-03 : f32
    %6 = vector.broadcast %cst_2 : f32 to vector<8x1xf32>
    %7 = arith.mulf %2, %6 : vector<8x1xf32>
    %8 = arith.mulf %2, %7 : vector<8x1xf32>
    %9 = arith.subf %5, %8 : vector<8x1xf32>
    %cst_3 = arith.constant 0.00392156886 : f32
    %10 = vector.broadcast %cst_3 : f32 to vector<8x1xf32>
    %11 = arith.mulf %9, %10 : vector<8x1xf32>
    %cst_4 = arith.constant 0.000000e+00 : f32
    %12 = vector.broadcast %cst_4 : f32 to vector<8x1xf32>
    %13 = arith.maximumf %11, %12 : vector<8x1xf32>
    %cst_5 = arith.constant 9.99999974E-6 : f32
    %14 = vector.broadcast %cst_5 : f32 to vector<8x1xf32>
    %15 = arith.addf %13, %14 : vector<8x1xf32>
    %16 = math.sqrt %15 : vector<8x1xf32>
    %cst_6 = arith.constant 9.99999974E-6 : f32
    %17 = vector.broadcast %cst_6 : f32 to vector<8x1xf32>
    %18 = arith.addf %16, %17 : vector<8x1xf32>
    %19 = tpu.reciprocal %18 : vector<8x1xf32> -> vector<8x1xf32>
    %c0_7 = arith.constant 0 : index
    %c0_8 = arith.constant 0 : index
    %20 = vector.load %arg3[%c0_7, %c0_8] : memref<8x1xf32, #tpu.memory_space<vmem>>, vector<8x1xf32>
    %21 = arith.mulf %20, %19 : vector<8x1xf32>
    %c0_9 = arith.constant 0 : index
    %c0_10 = arith.constant 0 : index
    %22 = vector.load %arg2[%c0_9, %c0_10] : memref<8x1xf32, #tpu.memory_space<vmem>>, vector<8x1xf32>
    %23 = arith.mulf %7, %21 : vector<8x1xf32>
    %24 = arith.subf %22, %23 : vector<8x1xf32>
    %25 = vector.broadcast %21 : vector<8x1xf32> to vector<8x256xf32>
    %26 = arith.mulf %0, %25 : vector<8x256xf32>
    %27 = vector.broadcast %24 : vector<8x1xf32> to vector<8x256xf32>
    %28 = arith.addf %26, %27 : vector<8x256xf32>
    %c0_11 = arith.constant 0 : index
    %c0_12 = arith.constant 0 : index
    %29 = vector.load %arg4[%c0_11, %c0_12] : memref<8x256xf32, #tpu.memory_space<vmem>>, vector<8x256xf32>
    tpu.vector_store %arg4[%c0_11, %c0_12], %28 {strides = array<i32>} : memref<8x256xf32, #tpu.memory_space<vmem>>, vector<8x256xf32>,
    return
  }
  func.func @transform_0(%arg0: i32) -> (i32, i32) {
    %c0_i32 = arith.constant 0 : i32
    %c0_i32_0 = arith.constant 0 : i32
    return %arg0, %c0_i32 : i32, i32
  }
  func.func @transform_1(%arg0: i32) -> (i32, i32) {
    %c0_i32 = arith.constant 0 : i32
    %c0_i32_0 = arith.constant 0 : i32
    return %arg0, %c0_i32 : i32, i32
  }
  func.func @transform_2(%arg0: i32) -> (i32, i32) {
    %c0_i32 = arith.constant 0 : i32
    %c0_i32_0 = arith.constant 0 : i32
    return %arg0, %c0_i32 : i32, i32
  }
  func.func @transform_3(%arg0: i32) -> (i32, i32) {
    %c0_i32 = arith.constant 0 : i32
    %c0_i32_0 = arith.constant 0 : i32
    return %arg0, %c0_i32 : i32, i32
  }
}

</mosaic_0001>

<bundles_post_ra>
// kernel: tpu_custom_call.1
= control target key start
LH: loop header
LB: loop body
LE: loop exit
PB: predicated region body
PF: predicated region fallthrough
CT: control target
= control target key end

     0   :  { %s153_s0 = inlined_call_operand.vmem [shape: f32[8,256], index: 0, kind: input, shape index: {}]   ;;  %s154_s1 = inlined_call_operand.vmem [shape: f32[8,1], index: 1, kind: input, shape index: {}]   ;;  %s155_s2 = inlined_call_operand.vmem [shape: f32[8,1], index: 2, kind: input, shape index: {}]   ;;  %s156_s3 = inlined_call_operand.hbm [shape: f32[8,256], index: 3, kind: output, shape index: {}]  }
   0x1   :  { %v15_v0 = vld [vmem:[%s153_s0] sm:$0xff]  ;;  %v16_v1 = vld [vmem:[%s153_s0 + $0x8] sm:$0xff] }
   0x2   :  { %8 = vsyncpa [#allocation3], 0  ;;  %v17_v2 = vadd.f32 %v16_v1, %v15_v0  ;;  %v20_v3 = vmul.f32 %v15_v0, %v15_v0  ;;  %v21_v4 = vmul.f32 %v16_v1, %v16_v1  ;;  %v107_v6 = vmov 0   ;;  %v40_v21 = vld [vmem:[%s155_s2] sm:$0xff]  ;;  %s108_s19 = smov [#allocation2]  }
   0x3   :  { %77 = vset.pattern.permute.xlu1 %v107_v6  ;;  %78 = vset.pattern.permute.xlu0 %v107_v6  ;;  %v42_v24 = vld [vmem:[%s154_s1] sm:$0xff]  ;;  %s67_s20 = sshll.u32 %s108_s19, 4  ;;  %s68_s20 = int_to_ptr.vmem [resolvable:$true] %s67_s20 }
   0x4   :  { %18 = vadd.xlane.f32.xlu0 %v17_v2  ;;  %v22_v5 = vadd.f32 %v21_v4, %v20_v3  ;;  %s83_s2 = scalar_lea.vmem %s68_s20, 256  ;;  %p88_p1 = scmp.lt.s32.totalorder %s68_s20, %s68_s20 }
   0x5   :  { %p84_p0 = scmp.ne.s32.totalorder %s68_s20, %s83_s2  ;;  %p89_p2 = scmp.lt.s32.totalorder %s83_s2, %s83_s2 }
   0x7   :  { %p90_p3 = por %p89_p2, %p88_p1 }
   0x8   :  { %23 = vadd.xlane.f32.xlu0 %v22_v5 }
   0x9   :  { %p91_p4 = pnand %p90_p3, %p84_p0 }
  0x91   :  { %v19_v7 = vpop.xlane.xlu0 %18 }
  0x92   :  { %v25_v8 = vmul.f32 0.00390625, %v19_v7 }
  0x94   :  { %v26_v9 = vmul.f32 %v25_v8, %v19_v7 }
  0x95   :  { %v24_v10 = vpop.xlane.xlu0 %23 }
  0x96   :  { %v27_v11 = vsub.f32 %v24_v10, %v26_v9 }
  0x98   :  { %v28_v12 = vmul.f32 0.003921569, %v27_v11 }
  0x9a   :  { %v29_v13 = vmax.f32 %v28_v12, 0.0 }
  0x9c   :  { %v30_v14 = vadd.f32 1e-05, %v29_v13 }
  0x9e   :  { %79 = vrsqrt.f32 %v30_v14  ;;  %vm33_vm0 = vcmp.eq.f32.partialorder %v30_v14, inf  ;;  %v36_v17 = vand.u32 2147483648, %v30_v14  ;;  %vm35_vm1 = vcmp.eq.f32.partialorder %v30_v14, 0.0 }
  0xa8   :  { %v80_v15 = vpop.eup %79 }
  0xa9   :  { %v32_v16 = vmul.f32 %v80_v15, %v30_v14 }
  0xab   :  { %v34_v18 = vsel %vm33_vm0, %v30_v14, %v32_v16 }
  0xac   :  { %v37_v19 = vsel %vm35_vm1, %v36_v17, %v34_v18 }
  0xad   :  { %v38_v20 = vadd.f32 1e-05, %v37_v19 }
  0xaf   :  { %81 = vrcp.f32 %v38_v20 }
  0xb9   :  { %v82_v22 = vpop.eup %81 }
  0xba   :  { %v41_v23 = vmul.f32 %v82_v22, %v40_v21 }
  0xbc   :  { %47 = vperm.xlu1 %77, %v41_v23   ;;  %v43_v25 = vmul.f32 %v41_v23, %v25_v8 }
  0xbe   :  { %v44_v26 = vsub.f32 %v42_v24, %v43_v25 }
  0xc0   :  { %54 = vperm.xlu1 %77, %v44_v26  }
 0x13b   :  { %v48_v27 = vpop.permute.xlu1 %47 }
 0x13c   :  { %v50_v28 = vmul.f32 %v48_v27, %v15_v0  ;;  %v51_v29 = vmul.f32 %v48_v27, %v16_v1 }
 0x13f   :  { %v55_v30 = vpop.permute.xlu1 %54 }
 0x140   :  { %v57_v31 = vadd.f32 %v55_v30, %v50_v28  ;;  %v58_v32 = vadd.f32 %v55_v30, %v51_v29 }
 0x142   :  { %59 = vst [vmem:[#allocation2] sm:$0xff] %v57_v31  ;;  %60 = vst [vmem:[#allocation2 + $0x8] sm:$0xff] %v58_v32 }
 0x143   :  { %94 = shalt.err (!%p91_p4)
}
 0x144   :  { %s95_s22 = scalar_lea.hbm %s156_s3, 256 }
 0x145   :  { %p96_p5 = scmp.ne.s32.totalorder %s156_s3, %s95_s22  ;;  %p99_p6 = scmp.lt.u32.totalorder %s95_s22, %s156_s3 }
 0x147   :  { %p101_p7 = pnand %p99_p6, %p96_p5 }
 0x149   :  { %104 = shalt.err (!%p101_p7)
}
 0x14a   :  { %70 = dma.vmem_to_hbm [thread:$0]  %s68_s20, 256, %s156_s3, [#allocation3]  }
 0x14b   :  { %105 = dma.done.wait [#allocation3], 256  }
 0x14c   :  { %106 = vsyncadd [#allocation3], 4294967040 }
 0x14d   :  { %74 = vsyncpa [#allocation3], 1 }

</bundles_post_ra>
